<compile_context>
chip_gen: v5e
topology: v5e:2x2
jax: 0.10.0
libtpu: 0.0.40
codegen_flags: <defaults>
</compile_context>

<pallas_src>
import jax
import jax.numpy as jnp
from jax.experimental import pallas as pl
from jax.experimental.pallas import tpu as pltpu


def _round_up(x, m):
    return (x + m - 1) // m * m


def rnn_seq_kernel(xs_ref, h0_ref, wcat_ref, bcat_ref, wo_ref, bo_ref,
                   out_ref, hfin_ref,
                   h_scr, hseq_scr):
    """One grid step == one RNN time step.

    xs_ref   : (1, Bp, Ip)    input block for this time step
    h0_ref   : (Bp, Hp)       initial hidden (resident)
    wcat_ref : (Ip+Hp, Hp)    fused [Wi; Wh] (pre-transposed, resident)
    bcat_ref : (1, Hp)        fused bias bi + bh (resident)
    wo_ref   : (Hp, Op)       output projection (pre-transposed, resident)
    bo_ref   : (1, Op)        output bias (resident)
    out_ref  : (T, Bp, Op)    all per-step outputs (written at last step)
    hfin_ref : (Bp, Hp)       final hidden state (written at last step)
    h_scr    : (Bp, Hp)       VMEM carry of the hidden state
    hseq_scr : (T, Bp, Hp)    VMEM store of every h_t for the hoisted proj.
    """
    t = pl.program_id(0)
    T, Bp, Hp = hseq_scr.shape

    @pl.when(t == 0)
    def _():
        h_scr[...] = h0_ref[...]

    x = xs_ref[0]                                            # (Bp, Ip)
    xh = jnp.concatenate([x, h_scr[...]], axis=-1)           # (Bp, Ip+Hp)

    # Fused i2h + h2h: single MXU push per step on the serial path.
    pre = jnp.dot(xh, wcat_ref[...],
                  preferred_element_type=jnp.float32) + bcat_ref[...]
    h_new = jnp.tanh(pre)                                    # (Bp, Hp)

    h_scr[...] = h_new
    hseq_scr[t] = h_new

    # Output projection hoisted out of the recurrence: one big lane-dense
    # matmul over all time steps at the final grid iteration.
    @pl.when(t == T - 1)
    def _():
        hfin_ref[...] = h_new.astype(hfin_ref.dtype)
        h_all = hseq_scr[...].reshape(T * Bp, Hp)            # (T*Bp, Hp)
        out = jnp.dot(h_all, wo_ref[...],
                      preferred_element_type=jnp.float32) + bo_ref[...]
        out_ref[...] = out.reshape(T, Bp, out_ref.shape[-1]).astype(out_ref.dtype)


def rnn_sequence(xs, h0, params):
    """Run the RNN cell over a whole sequence in one kernel launch.

    xs: (T, B, input_size), h0: (B, hidden_size)
    -> (outputs (T, B, output_size), hidden_final (B, hidden_size))
    """
    wi, bi, wh, bh, wo, bo = params          # wi:(I,H) wh:(H,H) wo:(H,O), biases 1-D
    T, B, I = xs.shape
    H = wh.shape[1]
    O = wo.shape[1]

    # Pad to lane-dense, (8,128)-aligned tiles.
    Bp = _round_up(max(B, 8), 8)
    Ip = _round_up(I, 128)
    Hp = _round_up(H, 128)
    Op = _round_up(O, 128)

    f32 = jnp.float32
    # Fused + padded weights / biases (zero padding keeps the math exact:
    # padded lanes of h stay identically zero step after step).
    w_cat = jnp.zeros((Ip + Hp, Hp), f32)
    w_cat = w_cat.at[:I, :H].set(wi.astype(f32))
    w_cat = w_cat.at[Ip:Ip + H, :H].set(wh.astype(f32))
    b_cat = jnp.zeros((1, Hp), f32).at[:, :H].set((bi + bh).astype(f32))
    wo_p = jnp.zeros((Hp, Op), f32).at[:H, :O].set(wo.astype(f32))
    bo_p = jnp.zeros((1, Op), f32).at[:, :O].set(bo.astype(f32))

    xs_p = jnp.zeros((T, Bp, Ip), f32).at[:, :B, :I].set(xs.astype(f32))
    h0_p = jnp.zeros((Bp, Hp), f32).at[:B, :H].set(h0.astype(f32))

    out_p, hfin_p = pl.pallas_call(
        rnn_seq_kernel,
        out_shape=(
            jax.ShapeDtypeStruct((T, Bp, Op), f32),
            jax.ShapeDtypeStruct((Bp, Hp), f32),
        ),
        grid_spec=pltpu.PrefetchScalarGridSpec(
            num_scalar_prefetch=0,
            grid=(T,),
            in_specs=[
                pl.BlockSpec((1, Bp, Ip), lambda t: (t, 0, 0)),       # xs: per-step
                pl.BlockSpec((Bp, Hp), lambda t: (0, 0)),             # h0: resident
                pl.BlockSpec((Ip + Hp, Hp), lambda t: (0, 0)),        # w_cat: resident
                pl.BlockSpec((1, Hp), lambda t: (0, 0)),              # b_cat: resident
                pl.BlockSpec((Hp, Op), lambda t: (0, 0)),             # wo: resident
                pl.BlockSpec((1, Op), lambda t: (0, 0)),              # bo: resident
            ],
            out_specs=(
                pl.BlockSpec((T, Bp, Op), lambda t: (0, 0, 0)),       # all outputs
                pl.BlockSpec((Bp, Hp), lambda t: (0, 0)),             # final hidden
            ),
            scratch_shapes=[
                pltpu.VMEM((Bp, Hp), f32),        # hidden-state carry
                pltpu.VMEM((T, Bp, Hp), f32),     # all h_t for hoisted projection
            ],
        ),
        compiler_params=pltpu.CompilerParams(
            dimension_semantics=("arbitrary",),   # time axis is a true recurrence
        ),
    )(xs_p, h0_p, w_cat, b_cat, wo_p, bo_p)

    return out_p[:, :B, :O], hfin_p[:B, :H]


def rnn_forward(x, h, params):
    """Single cell step, exactly RNNTorch.forward: (x, h) -> (output, hidden_new)."""
    out, h_new = rnn_sequence(x[None], h, params)
    return out[0], h_new


def init_params(key, input_size, hidden_size, output_size):
    """Deterministic uniform(-2, 2) init, mirroring the PyTorch module's
    uniform_(-n, n) with n=2 (seed differs; values are synthetic).
    Weights are stored pre-transposed as [in_features, out_features]."""
    ks = jax.random.split(key, 6)
    n = 2.0
    wi = jax.random.uniform(ks[0], (input_size, hidden_size), jnp.float32, -n, n)
    bi = jax.random.uniform(ks[1], (hidden_size,), jnp.float32, -n, n)
    wh = jax.random.uniform(ks[2], (hidden_size, hidden_size), jnp.float32, -n, n)
    bh = jax.random.uniform(ks[3], (hidden_size,), jnp.float32, -n, n)
    wo = jax.random.uniform(ks[4], (hidden_size, output_size), jnp.float32, -n, n)
    bo = jax.random.uniform(ks[5], (output_size,), jnp.float32, -n, n)
    return wi, bi, wh, bh, wo, bo


if __name__ == "__main__":
    input_size, hidden_size, output_size = 16, 32, 8
    batch, seq_len = 2, 8

    key = jax.random.PRNGKey(0)
    k_x, k_xs, k_p = jax.random.split(key, 3)

    params = init_params(k_p, input_size, hidden_size, output_size)
    wi, bi, wh, bh, wo, bo = params

    # --- single step: exactly RNNTorch.forward(input, hidden) ---
    x = jax.random.normal(k_x, (batch, input_size), jnp.float32)
    h0 = jnp.zeros((batch, hidden_size), jnp.float32)   # matches initHidden()

    out1, h1 = jax.jit(rnn_forward)(x, h0, params)
    jax.block_until_ready((out1, h1))

    h_ref = jnp.tanh(x @ wi + bi + h0 @ wh + bh)
    out_ref = h_ref @ wo + bo
    assert jnp.allclose(out1, out_ref, atol=1e-5), "single-step output mismatch"
    assert jnp.allclose(h1, h_ref, atol=1e-5), "single-step hidden mismatch"

    # --- whole sequence in ONE kernel launch (weights resident, fused matmul,
    #     hoisted output projection) ---
    xs = jax.random.normal(k_xs, (seq_len, batch, input_size), jnp.float32)
    outs, h_fin = jax.jit(rnn_sequence)(xs, h0, params)
    jax.block_until_ready((outs, h_fin))

    # pure-JAX reference recurrence
    h_r = h0
    ref_outs = []
    for t in range(seq_len):
        h_r = jnp.tanh(xs[t] @ wi + bi + h_r @ wh + bh)
        ref_outs.append(h_r @ wo + bo)
    ref_outs = jnp.stack(ref_outs)
    assert jnp.allclose(outs, ref_outs, atol=1e-4), "sequence output mismatch"
    assert jnp.allclose(h_fin, h_r, atol=1e-4), "sequence hidden mismatch"

    print("KERNEL_OK")
</pallas_src>

<mosaic_0001>
module attributes {stable_mosaic.version = 11 : i64} {
  func.func @rnn_seq_kernel(%arg0: i32, %arg1: memref<1x8x128xf32, #tpu.memory_space<vmem>>, %arg2: memref<8x128xf32, #tpu.memory_space<vmem>>, %arg3: memref<256x128xf32, #tpu.memory_space<vmem>>, %arg4: memref<1x128xf32, #tpu.memory_space<vmem>>, %arg5: memref<128x128xf32, #tpu.memory_space<vmem>>, %arg6: memref<1x128xf32, #tpu.memory_space<vmem>>, %arg7: memref<1x8x128xf32, #tpu.memory_space<vmem>>, %arg8: memref<8x128xf32, #tpu.memory_space<vmem>>, %arg9: memref<8x128xf32, #tpu.memory_space<vmem>>, %arg10: memref<1x8x128xf32, #tpu.memory_space<vmem>>) attributes {dimension_semantics = [#tpu.dimension_semantics<arbitrary>], iteration_bounds = array<i64: 1>, scalar_prefetch = 0 : i64, scratch_operands = 2 : i64, tpu.core_type = #tpu.core_type<tc>, window_params = [{transform_indices = @transform_0, window_bounds = array<i64: 1, 8, 128>}, {pipeline_mode = #tpu.pipeline_mode<synchronous>, transform_indices = @transform_1, window_bounds = array<i64: 8, 128>}, {pipeline_mode = #tpu.pipeline_mode<synchronous>, transform_indices = @transform_2, window_bounds = array<i64: 256, 128>}, {pipeline_mode = #tpu.pipeline_mode<synchronous>, transform_indices = @transform_3, window_bounds = array<i64: 1, 128>}, {pipeline_mode = #tpu.pipeline_mode<synchronous>, transform_indices = @transform_4, window_bounds = array<i64: 128, 128>}, {pipeline_mode = #tpu.pipeline_mode<synchronous>, transform_indices = @transform_5, window_bounds = array<i64: 1, 128>}, {pipeline_mode = #tpu.pipeline_mode<synchronous>, transform_indices = @transform_6, window_bounds = array<i64: 1, 8, 128>}, {pipeline_mode = #tpu.pipeline_mode<synchronous>, transform_indices = @transform_7, window_bounds = array<i64: 8, 128>}]} {
    %c0_i32 = arith.constant 0 : i32
    %0 = arith.cmpi eq, %arg0, %c0_i32 : i32
    %1 = arith.extui %0 : i1 to i32
    %c0_i32_0 = arith.constant 0 : i32
    %2 = arith.cmpi ne, %1, %c0_i32_0 : i32
    scf.if %2 {
      %c0_15 = arith.constant 0 : index
      %c0_16 = arith.constant 0 : index
      %21 = vector.load %arg2[%c0_15, %c0_16] : memref<8x128xf32, #tpu.memory_space<vmem>>, vector<8x128xf32>
      %c0_17 = arith.constant 0 : index
      %c0_18 = arith.constant 0 : index
      %22 = vector.load %arg9[%c0_17, %c0_18] : memref<8x128xf32, #tpu.memory_space<vmem>>, vector<8x128xf32>
      tpu.vector_store %arg9[%c0_17, %c0_18], %21 {strides = array<i32>} : memref<8x128xf32, #tpu.memory_space<vmem>>, vector<8x128xf32>,
    } else {
    }
    %c0 = arith.constant 0 : index
    %c0_1 = arith.constant 0 : index
    %c0_2 = arith.constant 0 : index
    %3 = vector.load %arg1[%c0, %c0_1, %c0_2] : memref<1x8x128xf32, #tpu.memory_space<vmem>>, vector<1x8x128xf32>
    %4 = vector.shape_cast %3 : vector<1x8x128xf32> to vector<8x128xf32>
    %c0_3 = arith.constant 0 : index
    %c0_4 = arith.constant 0 : index
    %5 = vector.load %arg9[%c0_3, %c0_4] : memref<8x128xf32, #tpu.memory_space<vmem>>, vector<8x128xf32>
    %6 = tpu.concatenate %4, %5 in 1 : vector<8x128xf32>, vector<8x128xf32> -> vector<8x256xf32>
    %c0_5 = arith.constant 0 : index
    %c0_6 = arith.constant 0 : index
    %7 = vector.load %arg3[%c0_5, %c0_6] : memref<256x128xf32, #tpu.memory_space<vmem>>, vector<256x128xf32>
    %cst = arith.constant dense<0.000000e+00> : vector<8x128xf32>
    %8 = tpu.matmul %6, %7, %cst {dimension_numbers = #tpu.dot_dimension_numbers<[1], [0], [0], [1], [0, 0, 1, 1], [], []>} : vector<8x256xf32>, vector<256x128xf32>, vector<8x128xf32> -> vector<8x128xf32>
    %c0_7 = arith.constant 0 : index
    %c0_8 = arith.constant 0 : index
    %9 = vector.load %arg4[%c0_7, %c0_8] : memref<1x128xf32, #tpu.memory_space<vmem>>, vector<1x128xf32>
    %10 = vector.broadcast %9 : vector<1x128xf32> to vector<8x128xf32>
    %11 = arith.addf %8, %10 : vector<8x128xf32>
    %12 = math.tanh %11 : vector<8x128xf32>
    %c0_9 = arith.constant 0 : index
    %c0_10 = arith.constant 0 : index
    %13 = vector.load %arg9[%c0_9, %c0_10] : memref<8x128xf32, #tpu.memory_space<vmem>>, vector<8x128xf32>
    tpu.vector_store %arg9[%c0_9, %c0_10], %12 {strides = array<i32>} : memref<8x128xf32, #tpu.memory_space<vmem>>, vector<8x128xf32>,
    %14 = arith.index_cast %arg0 : i32 to index
    %c0_11 = arith.constant 0 : index
    %c0_12 = arith.constant 0 : index
    %15 = vector.load %arg10[%14, %c0_11, %c0_12] : memref<1x8x128xf32, #tpu.memory_space<vmem>>, vector<1x8x128xf32>
    %16 = vector.shape_cast %15 : vector<1x8x128xf32> to vector<8x128xf32>
    %17 = vector.shape_cast %12 : vector<8x128xf32> to vector<1x8x128xf32>
    tpu.vector_store %arg10[%14, %c0_11, %c0_12], %17 {strides = array<i32>} : memref<1x8x128xf32, #tpu.memory_space<vmem>>, vector<1x8x128xf32>,
    %c0_i32_13 = arith.constant 0 : i32
    %18 = arith.cmpi eq, %arg0, %c0_i32_13 : i32
    %19 = arith.extui %18 : i1 to i32
    %c0_i32_14 = arith.constant 0 : i32
    %20 = arith.cmpi ne, %19, %c0_i32_14 : i32
    scf.if %20 {
      %c0_15 = arith.constant 0 : index
      %c0_16 = arith.constant 0 : index
      %21 = vector.load %arg8[%c0_15, %c0_16] : memref<8x128xf32, #tpu.memory_space<vmem>>, vector<8x128xf32>
      tpu.vector_store %arg8[%c0_15, %c0_16], %12 {strides = array<i32>} : memref<8x128xf32, #tpu.memory_space<vmem>>, vector<8x128xf32>,
      %c0_17 = arith.constant 0 : index
      %c0_18 = arith.constant 0 : index
      %c0_19 = arith.constant 0 : index
      %22 = vector.load %arg10[%c0_17, %c0_18, %c0_19] : memref<1x8x128xf32, #tpu.memory_space<vmem>>, vector<1x8x128xf32>
      %23 = vector.shape_cast %22 : vector<1x8x128xf32> to vector<8x128xf32>
      %c0_20 = arith.constant 0 : index
      %c0_21 = arith.constant 0 : index
      %24 = vector.load %arg5[%c0_20, %c0_21] : memref<128x128xf32, #tpu.memory_space<vmem>>, vector<128x128xf32>
      %cst_22 = arith.constant dense<0.000000e+00> : vector<8x128xf32>
      %25 = tpu.matmul %23, %24, %cst_22 {dimension_numbers = #tpu.dot_dimension_numbers<[1], [0], [0], [1], [0, 0, 1, 1], [], []>} : vector<8x128xf32>, vector<128x128xf32>, vector<8x128xf32> -> vector<8x128xf32>
      %c0_23 = arith.constant 0 : index
      %c0_24 = arith.constant 0 : index
      %26 = vector.load %arg6[%c0_23, %c0_24] : memref<1x128xf32, #tpu.memory_space<vmem>>, vector<1x128xf32>
      %27 = vector.broadcast %26 : vector<1x128xf32> to vector<8x128xf32>
      %28 = arith.addf %25, %27 : vector<8x128xf32>
      %29 = vector.shape_cast %28 : vector<8x128xf32> to vector<1x8x128xf32>
      %c0_25 = arith.constant 0 : index
      %c0_26 = arith.constant 0 : index
      %c0_27 = arith.constant 0 : index
      %30 = vector.load %arg7[%c0_25, %c0_26, %c0_27] : memref<1x8x128xf32, #tpu.memory_space<vmem>>, vector<1x8x128xf32>
      tpu.vector_store %arg7[%c0_25, %c0_26, %c0_27], %29 {strides = array<i32>} : memref<1x8x128xf32, #tpu.memory_space<vmem>>, vector<1x8x128xf32>,
    } else {
    }
    return
  }
  func.func @transform_0(%arg0: i32) -> (i32, i32, i32) {
    %c0_i32 = arith.constant 0 : i32
    %c0_i32_0 = arith.constant 0 : i32
    %c0_i32_1 = arith.constant 0 : i32
    return %arg0, %c0_i32, %c0_i32_0 : i32, i32, i32
  }
  func.func @transform_1(%arg0: i32) -> (i32, i32) {
    %c0_i32 = arith.constant 0 : i32
    %c0_i32_0 = arith.constant 0 : i32
    %c0_i32_1 = arith.constant 0 : i32
    return %c0_i32, %c0_i32_0 : i32, i32
  }
  func.func @transform_2(%arg0: i32) -> (i32, i32) {
    %c0_i32 = arith.constant 0 : i32
    %c0_i32_0 = arith.constant 0 : i32
    %c0_i32_1 = arith.constant 0 : i32
    return %c0_i32, %c0_i32_0 : i32, i32
  }
  func.func @transform_3(%arg0: i32) -> (i32, i32) {
    %c0_i32 = arith.constant 0 : i32
    %c0_i32_0 = arith.constant 0 : i32
    %c0_i32_1 = arith.constant 0 : i32
    return %c0_i32, %c0_i32_0 : i32, i32
  }
  func.func @transform_4(%arg0: i32) -> (i32, i32) {
    %c0_i32 = arith.constant 0 : i32
    %c0_i32_0 = arith.constant 0 : i32
    %c0_i32_1 = arith.constant 0 : i32
    return %c0_i32, %c0_i32_0 : i32, i32
  }
  func.func @transform_5(%arg0: i32) -> (i32, i32) {
    %c0_i32 = arith.constant 0 : i32
    %c0_i32_0 = arith.constant 0 : i32
    %c0_i32_1 = arith.constant 0 : i32
    return %c0_i32, %c0_i32_0 : i32, i32
  }
  func.func @transform_6(%arg0: i32) -> (i32, i32, i32) {
    %c0_i32 = arith.constant 0 : i32
    %c0_i32_0 = arith.constant 0 : i32
    %c0_i32_1 = arith.constant 0 : i32
    %c0_i32_2 = arith.constant 0 : i32
    return %c0_i32, %c0_i32_0, %c0_i32_1 : i32, i32, i32
  }
  func.func @transform_7(%arg0: i32) -> (i32, i32) {
    %c0_i32 = arith.constant 0 : i32
    %c0_i32_0 = arith.constant 0 : i32
    %c0_i32_1 = arith.constant 0 : i32
    return %c0_i32, %c0_i32_0 : i32, i32
  }
}

</mosaic_0001>

<bundles_post_ra>
// kernel: rnn_forward.1
= control target key start
LH: loop header
LB: loop body
LE: loop exit
PB: predicated region body
PF: predicated region fallthrough
CT: control target
= control target key end

     0   :  { %s374_s2 = inlined_call_operand.vmem [shape: f32[256,128], index: 2, kind: input, shape index: {}]   ;;  %s375_s4 = inlined_call_operand.vmem [shape: f32[128,128], index: 4, kind: input, shape index: {}]   ;;  %s376_s3 = inlined_call_operand.vmem [shape: f32[1,128], index: 3, kind: input, shape index: {}]   ;;  %s377_s0 = inlined_call_operand.vmem [shape: f32[1,8,128], index: 0, kind: input, shape index: {}]   ;;  %s378_s1 = inlined_call_operand.vmem [shape: f32[8,128], index: 1, kind: input, shape index: {}]   ;;  %s379_s5 = inlined_call_operand.vmem [shape: f32[1,128], index: 5, kind: input, shape index: {}]   ;;  %s380_s7 = inlined_call_operand.vmem [shape: f32[8,128], index: 7, kind: output, shape index: {1}]   ;;  %s381_s6 = inlined_call_operand.vmem [shape: f32[1,8,128], index: 6, kind: output, shape index: {0}]  }
   0x1   :  { %v48_v0 = vld [vmem:[%s374_s2 + $0x78] sm:$0xff]  ;;  %v47_v1 = vld [vmem:[%s374_s2 + $0x70] sm:$0xff]  ;;  %v46_v4 = vld [vmem:[%s374_s2 + $0x68] sm:$0xff] }
   0x2   :  { %v64_v2 = vld [vmem:[%s374_s2 + $0xf8] sm:$0xff]  ;;  %69 = vmatpush.msra.mxu0 %v48_v0  ;;  %v63_v3 = vld [vmem:[%s374_s2 + $0xf0] sm:$0xff]  ;;  %v62_v5 = vld [vmem:[%s374_s2 + $0xe8] sm:$0xff] }
   0x3   :  { %89 = vmatpush.msra.mxu1 %v64_v2  ;;  %v45_v6 = vld [vmem:[%s374_s2 + $0x60] sm:$0xff]  ;;  %v44_v8 = vld [vmem:[%s374_s2 + $0x58] sm:$0xff]  ;;  %v43_v10 = vld [vmem:[%s374_s2 + $0x50] sm:$0xff] }
   0x4   :  { %70 = vmatpush.msra.mxu0 %v47_v1  ;;  %v61_v7 = vld [vmem:[%s374_s2 + $0xe0] sm:$0xff]  ;;  %v60_v9 = vld [vmem:[%s374_s2 + $0xd8] sm:$0xff]  ;;  %v59_v11 = vld [vmem:[%s374_s2 + $0xd0] sm:$0xff] }
   0x5   :  { %90 = vmatpush.msra.mxu1 %v63_v3  ;;  %v42_v12 = vld [vmem:[%s374_s2 + $0x48] sm:$0xff]  ;;  %v134_v14 = vld [vmem:[%s375_s4 + $0x78] sm:$0xff]  ;;  %v133_v15 = vld [vmem:[%s375_s4 + $0x70] sm:$0xff] }
   0x6   :  { %71 = vmatpush.msra.mxu0 %v46_v4  ;;  %v58_v13 = vld [vmem:[%s374_s2 + $0xc8] sm:$0xff]  ;;  %v41_v16 = vld [vmem:[%s374_s2 + $0x40] sm:$0xff]  ;;  %139 = vmatpush.msra.mxu2 %v134_v14  ;;  %v40_v19 = vld [vmem:[%s374_s2 + $0x38] sm:$0xff] }
   0x7   :  { %91 = vmatpush.msra.mxu1 %v62_v5  ;;  %v57_v17 = vld [vmem:[%s374_s2 + $0xc0] sm:$0xff]  ;;  %v132_v18 = vld [vmem:[%s375_s4 + $0x68] sm:$0xff]  ;;  %v56_v20 = vld [vmem:[%s374_s2 + $0xb8] sm:$0xff] }
   0x8   :  { %72 = vmatpush.msra.mxu0 %v45_v6  ;;  %140 = vmatpush.msra.mxu2 %v133_v15  ;;  %v131_v21 = vld [vmem:[%s375_s4 + $0x60] sm:$0xff]  ;;  %v39_v22 = vld [vmem:[%s374_s2 + $0x30] sm:$0xff]  ;;  %v130_v24 = vld [vmem:[%s375_s4 + $0x58] sm:$0xff] }
   0x9   :  { %92 = vmatpush.msra.mxu1 %v61_v7  ;;  %v55_v23 = vld [vmem:[%s374_s2 + $0xb0] sm:$0xff]  ;;  %v38_v25 = vld [vmem:[%s374_s2 + $0x28] sm:$0xff]  ;;  %v37_v28 = vld [vmem:[%s374_s2 + $0x20] sm:$0xff] }
   0xa   :  { %73 = vmatpush.msra.mxu0 %v44_v8  ;;  %141 = vmatpush.msra.mxu2 %v132_v18  ;;  %v54_v26 = vld [vmem:[%s374_s2 + $0xa8] sm:$0xff]  ;;  %v129_v27 = vld [vmem:[%s375_s4 + $0x50] sm:$0xff]  ;;  %v53_v29 = vld [vmem:[%s374_s2 + $0xa0] sm:$0xff] }
   0xb   :  { %93 = vmatpush.msra.mxu1 %v60_v9  ;;  %v128_v30 = vld [vmem:[%s375_s4 + $0x48] sm:$0xff]  ;;  %v36_v31 = vld [vmem:[%s374_s2 + $0x18] sm:$0xff]  ;;  %v127_v33 = vld [vmem:[%s375_s4 + $0x40] sm:$0xff] }
   0xc   :  { %74 = vmatpush.msra.mxu0 %v43_v10  ;;  %142 = vmatpush.msra.mxu2 %v131_v21  ;;  %v52_v32 = vld [vmem:[%s374_s2 + $0x98] sm:$0xff]  ;;  %v35_v34 = vld [vmem:[%s374_s2 + $0x10] sm:$0xff]  ;;  %v34_v37 = vld [vmem:[%s374_s2 + $0x8] sm:$0xff] }
   0xd   :  { %94 = vmatpush.msra.mxu1 %v59_v11  ;;  %v51_v35 = vld [vmem:[%s374_s2 + $0x90] sm:$0xff]  ;;  %v126_v36 = vld [vmem:[%s375_s4 + $0x38] sm:$0xff]  ;;  %v50_v38 = vld [vmem:[%s374_s2 + $0x88] sm:$0xff] }
   0xe   :  { %75 = vmatpush.msra.mxu0 %v42_v12  ;;  %143 = vmatpush.msra.mxu2 %v130_v24  ;;  %v125_v39 = vld [vmem:[%s375_s4 + $0x30] sm:$0xff]  ;;  %v33_v40 = vld [vmem:[%s374_s2] sm:$0xff]  ;;  %v124_v44 = vld [vmem:[%s375_s4 + $0x28] sm:$0xff] }
   0xf   :  { %95 = vmatpush.msra.mxu1 %v58_v13  ;;  %v49_v41 = vld [vmem:[%s374_s2 + $0x80] sm:$0xff]  ;;  %v122_v46 = vld [vmem:[%s375_s4 + $0x18] sm:$0xff]  ;;  %v121_v47 = vld [vmem:[%s375_s4 + $0x10] sm:$0xff] }
  0x10   :  { %76 = vmatpush.msra.mxu0 %v41_v16  ;;  %144 = vmatpush.msra.mxu2 %v129_v27  ;;  %v31_v42 = vld [vmem:[%s377_s0] sm:$0xff]  ;;  %v120_v48 = vld [vmem:[%s375_s4 + $0x8] sm:$0xff] }
  0x11   :  { %96 = vmatpush.msra.mxu1 %v57_v17  ;;  %v29_v43 = vld [vmem:[%s378_s1] sm:$0xff] }
  0x12   :  { %77 = vmatpush.msra.mxu0 %v40_v19  ;;  %145 = vmatpush.msra.mxu2 %v128_v30  ;;  %v123_v45 = vld [vmem:[%s375_s4 + $0x20] sm:$0xff] }
  0x13   :  { %97 = vmatpush.msra.mxu1 %v56_v20  ;;  %v119_v49 = vld [vmem:[%s375_s4] sm:$0xff] }
  0x14   :  { %78 = vmatpush.msra.mxu0 %v39_v22  ;;  %146 = vmatpush.msra.mxu2 %v127_v33  ;;  %v168_v50 = vld [vmem:[%s376_s3] ss:$0 sm:$0xff] }
  0x15   :  { %98 = vmatpush.msra.mxu1 %v55_v23  ;;  %v169_v56 = vld [vmem:[%s379_s5] ss:$0 sm:$0xff] }
  0x16   :  { %79 = vmatpush.msra.mxu0 %v38_v25  ;;  %147 = vmatpush.msra.mxu2 %v126_v36 }
  0x17   :  { %99 = vmatpush.msra.mxu1 %v54_v26 }
  0x18   :  { %80 = vmatpush.msra.mxu0 %v37_v28  ;;  %148 = vmatpush.msra.mxu2 %v125_v39 }
  0x19   :  { %100 = vmatpush.msra.mxu1 %v53_v29 }
  0x1a   :  { %81 = vmatpush.msra.mxu0 %v36_v31  ;;  %149 = vmatpush.msra.mxu2 %v124_v44 }
  0x1b   :  { %101 = vmatpush.msra.mxu1 %v52_v32 }
  0x1c   :  { %82 = vmatpush.msra.mxu0 %v35_v34  ;;  %150 = vmatpush.msra.mxu2 %v123_v45 }
  0x1d   :  { %102 = vmatpush.msra.mxu1 %v51_v35 }
  0x1e   :  { %83 = vmatpush.msra.mxu0 %v34_v37  ;;  %151 = vmatpush.msra.mxu2 %v122_v46 }
  0x1f   :  { %103 = vmatpush.msra.mxu1 %v50_v38 }
  0x20   :  { %84 = vmatpush.msra.mxu0 %v33_v40  ;;  %152 = vmatpush.msra.mxu2 %v121_v47 }
  0x21   :  { %104 = vmatpush.msra.mxu1 %v49_v41  ;;  %85 = vmatmul.f32.vlgmr.msra.gmra.mxu0 %v31_v42 }
  0x22   :  { %105 = vmatmul.f32.vlgmr.msra.gmra.mxu1 %v29_v43  ;;  %153 = vmatpush.msra.mxu2 %v120_v48 }
  0x24   :  { %154 = vmatpush.msra.mxu2 %v119_v49 }
  0x9e   :  { %v86_v51 = vpop.f32.mrf.mxu0 }
  0x9f   :  { %v106_v52 = vpop.f32.mrf.mxu1  ;;  %v87_v53 = vadd.f32 %v168_v50, %v86_v51 }
  0xa1   :  { %v107_v54 = vadd.f32 %v106_v52, %v87_v53 }
  0xa3   :  { %170 = vtanh.f32 %v107_v54 }
  0xa9   :  { %v171_v55 = vpop.eup %170 }
  0xaa   :  { %117 = vst [vmem:[%s380_s7] sm:$0xff] %v171_v55  ;;  %155 = vmatmul.f32.vlgmr.msra.gmra.mxu2 %v171_v55 }
 0x12d   :  { %v156_v57 = vpop.f32.mrf.mxu2 }
 0x12e   :  { %v157_v58 = vadd.f32 %v169_v56, %v156_v57 }
 0x130   :  { %159 = vst [vmem:[%s381_s6] sm:$0xff] %v157_v58 }

</bundles_post_ra>
